<compile_context>
chip_gen: v7x
topology: tpu7x:2x2x1
jax: 0.10.0
libtpu: 0.0.40
codegen_flags: <defaults>
</compile_context>

<pallas_src>
import functools
import math

import jax
import jax.numpy as jnp
from jax import lax
from jax.experimental import pallas as pl
from jax.experimental.pallas import tpu as pltpu


def _round_up(x: int, m: int) -> int:
    return (x + m - 1) // m * m


def _vmem_capacity_bytes() -> int:
    try:
        return max(int(pltpu.get_tpu_info().vmem_capacity_bytes), 32 << 20)
    except Exception:
        return 64 << 20        # conservative fallback: v7x per-core VMEM


# --------------------------------------------------------------------------
# Kernel 1: row L2-normalize (f32 math, output in MXU dtype). Memory-bound,
# so the row tile is as large as the VMEM budget allows.
# --------------------------------------------------------------------------
def _normalize_kernel(f_ref, out_ref):
    f = f_ref[...].astype(jnp.float32)                          # (TR, Dp)
    sq = jnp.sum(f * f, axis=1, keepdims=True)                  # (TR, 1)
    # F.normalize(p=2, dim=1): x / max(||x||, 1e-12) == x * rsqrt(max(sq, 1e-24))
    out_ref[...] = (f * lax.rsqrt(jnp.maximum(sq, 1e-24))).astype(out_ref.dtype)


# --------------------------------------------------------------------------
# Kernel 2a: resident-key variant.  One grid axis over anchor-row tiles; the
# full normalized key matrix stays resident (single-buffered) in VMEM and the
# anchor tile is aliased out of it (no second HBM stream).
# --------------------------------------------------------------------------
def _scl_loss_resident_kernel(fk_ref, labq_ref, labk_ref, out_ref, *,
                              inv_t: float, neg_scale: float, n_valid: int):
    tq = labq_ref.shape[0]
    bp = fk_ref.shape[0]
    i = pl.program_id(0)
    start = pl.multiple_of(i * tq, tq)

    fq = fk_ref[pl.ds(start, tq), :]                             # (TQ, Dp) anchors
    sim = lax.dot_general(fq, fk_ref[...],
                          dimension_numbers=(((1,), (1,)), ((), ())),
                          preferred_element_type=jnp.float32)    # (TQ, Bp) on MXU
    logits = sim * inv_t

    row_ids = start + lax.broadcasted_iota(jnp.int32, (tq, 1), 0)   # (TQ, 1)
    col_ids = lax.broadcasted_iota(jnp.int32, (1, bp), 1)           # (1, Bp)
    # logits_mask: drop diagonal and padded key columns
    keep = jnp.logical_and(col_ids != row_ids, col_ids < n_valid)   # (TQ, Bp)

    denom = jnp.sum(jnp.where(keep, jnp.exp(logits), 0.0),
                    axis=1, keepdims=True) + 1e-08                  # (TQ, 1)

    pos = jnp.logical_and(labq_ref[...] == labk_ref[...], keep)     # (TQ, Bp)
    mask_sum = jnp.sum(pos.astype(jnp.float32), axis=1, keepdims=True)
    sum_pos_logits = jnp.sum(jnp.where(pos, logits, 0.0), axis=1, keepdims=True)

    # == sum(pos * (logits - log(denom))) / (mask_sum + eps), without the slab.
    mean_log_prob_pos = (sum_pos_logits - mask_sum * jnp.log(denom)) / (mask_sum + 1e-08)

    row_valid = row_ids < n_valid
    loss_rows = jnp.where(row_valid, neg_scale * mean_log_prob_pos, 0.0)

    tile_sum = jnp.sum(loss_rows, axis=0, keepdims=True)            # (1, 1)
    out_ref[...] = jnp.broadcast_to(tile_sum, out_ref.shape).astype(jnp.float32)


# --------------------------------------------------------------------------
# Kernel 2b: key-tiled streaming fallback for large batches.  Second grid
# axis over key tiles ("arbitrary", innermost) with (TQ, 1) accumulators in
# VMEM scratch; no running max needed since logits <= 1/T (matches reference,
# which also has no max subtraction).
# --------------------------------------------------------------------------
def _scl_loss_tiled_kernel(fq_ref, fk_ref, labq_ref, labk_ref, out_ref,
                           denom_acc, msum_acc, psum_acc, *,
                           inv_t: float, neg_scale: float, n_valid: int):
    tq = labq_ref.shape[0]
    tk = labk_ref.shape[1]
    i = pl.program_id(0)
    k = pl.program_id(1)
    nk = pl.num_programs(1)

    @pl.when(k == 0)
    def _():
        denom_acc[...] = jnp.zeros_like(denom_acc)
        msum_acc[...] = jnp.zeros_like(msum_acc)
        psum_acc[...] = jnp.zeros_like(psum_acc)

    sim = lax.dot_general(fq_ref[...], fk_ref[...],
                          dimension_numbers=(((1,), (1,)), ((), ())),
                          preferred_element_type=jnp.float32)    # (TQ, TK)
    logits = sim * inv_t

    row_ids = i * tq + lax.broadcasted_iota(jnp.int32, (tq, 1), 0)   # (TQ, 1)
    col_ids = k * tk + lax.broadcasted_iota(jnp.int32, (1, tk), 1)   # (1, TK)
    keep = jnp.logical_and(col_ids != row_ids, col_ids < n_valid)    # (TQ, TK)

    denom_acc[...] += jnp.sum(jnp.where(keep, jnp.exp(logits), 0.0),
                              axis=1, keepdims=True)
    pos = jnp.logical_and(labq_ref[...] == labk_ref[...], keep)
    msum_acc[...] += jnp.sum(pos.astype(jnp.float32), axis=1, keepdims=True)
    psum_acc[...] += jnp.sum(jnp.where(pos, logits, 0.0), axis=1, keepdims=True)

    @pl.when(k == nk - 1)
    def _():
        denom = denom_acc[...] + 1e-08
        mask_sum = msum_acc[...]
        mean_log_prob_pos = (psum_acc[...] - mask_sum * jnp.log(denom)) / (mask_sum + 1e-08)
        row_valid = row_ids < n_valid
        loss_rows = jnp.where(row_valid, neg_scale * mean_log_prob_pos, 0.0)
        tile_sum = jnp.sum(loss_rows, axis=0, keepdims=True)         # (1, 1)
        out_ref[...] = jnp.broadcast_to(tile_sum, out_ref.shape).astype(jnp.float32)


# --------------------------------------------------------------------------
# Wrapper
# --------------------------------------------------------------------------
def supervised_contrastive_loss(features, labels,
                                temperature: float = 0.07,
                                base_temperature: float = 0.07,
                                tq: int | None = None,
                                tk: int | None = None,
                                force_key_tiling: bool = False):
    """features: [B, D] float (f32 or bf16); labels: [B] int. Returns scalar loss."""
    B, D = features.shape
    mxu_dtype = jnp.bfloat16 if features.dtype == jnp.bfloat16 else jnp.float32
    isz = jnp.dtype(mxu_dtype).itemsize
    in_isz = jnp.dtype(features.dtype).itemsize
    sub = 16 if mxu_dtype == jnp.bfloat16 else 8                 # sublane multiple
    vmem_cap = _vmem_capacity_bytes()

    # anchor-row tile: 128 by default; 256 for bf16 on large-VMEM parts (v6e-class)
    if tq is None:
        tq_cap = 256 if (mxu_dtype == jnp.bfloat16 and vmem_cap >= (96 << 20)) else 128
        tq = min(tq_cap, _round_up(B, sub))
    tq = max(sub, _round_up(int(tq), sub))

    Dp = _round_up(D, 128)                                        # lane-align features
    Bp = _round_up(B, tq)                                         # tile-align batch

    # resident-key VMEM footprint: keys x1 (Buffered(1)) + key labels + anchor
    # labels (double-buffered) + ~5 live (tq, Bp) f32 slabs + outputs + headroom
    est_resident = (Bp * Dp * isz + Bp * 4 + 4 * tq * 4
                    + 5 * tq * Bp * 4 + 2 * 8 * 128 * 4 + (2 << 20))
    use_key_tiling = force_key_tiling or est_resident > int(0.8 * vmem_cap)

    if use_key_tiling:
        base = math.lcm(128, tq)                                  # tk: x128 (lane) and x tq
        if tk is None:
            tk = base * max(1, 512 // base)
        else:
            tk = max(base, _round_up(int(tk), base))
        Bp = _round_up(B, tk)                                     # multiple of tq too

    # zero-pad in the ORIGINAL dtype (no host-side f32 cast)
    feats_p = jnp.pad(features, ((0, Bp - B), (0, Dp - D)))
    labels_p = jnp.pad(labels.astype(jnp.int32), (0, Bp - B))
    lab_col = labels_p.reshape(Bp, 1)
    lab_row = labels_p.reshape(1, Bp)

    # ---- Kernel 1: normalize rows with large, VMEM-budgeted row tiles --------
    tr = min(Bp, 1024)
    while tr > sub and 2 * tr * Dp * (in_isz + isz) + 2 * tr * Dp * 4 > vmem_cap // 2:
        tr //= 2
    tr = max(sub, tr - tr % sub)
    while Bp % tr != 0:
        tr -= sub
    est1 = 2 * tr * Dp * (in_isz + isz) + 2 * tr * Dp * 4 + (1 << 20)
    limit1 = int(min(max(est1, 16 << 20), int(0.9 * vmem_cap)))

    feats_n = pl.pallas_call(
        _normalize_kernel,
        out_shape=jax.ShapeDtypeStruct((Bp, Dp), mxu_dtype),
        grid_spec=pltpu.PrefetchScalarGridSpec(
            num_scalar_prefetch=0,
            grid=(Bp // tr,),
            in_specs=[pl.BlockSpec((tr, Dp), lambda i: (i, 0))],
            out_specs=pl.BlockSpec((tr, Dp), lambda i: (i, 0)),
        ),
        compiler_params=pltpu.CompilerParams(
            dimension_semantics=("parallel",),
            vmem_limit_bytes=limit1),
    )(feats_p)

    inv_t = float(1.0 / temperature)
    neg_scale = float(-(temperature / base_temperature))
    num_q = Bp // tq

    if not use_key_tiling:
        # ---- Kernel 2a: resident keys, anchors aliased out of the key buffer --
        kernel = functools.partial(_scl_loss_resident_kernel,
                                   inv_t=inv_t, neg_scale=neg_scale, n_valid=int(B))
        vmem_limit = int(min(max(est_resident, 32 << 20), int(0.9 * vmem_cap)))
        per_tile = pl.pallas_call(
            kernel,
            out_shape=jax.ShapeDtypeStruct((num_q, 8, 128), jnp.float32),
            grid_spec=pltpu.PrefetchScalarGridSpec(
                num_scalar_prefetch=0,
                grid=(num_q,),
                in_specs=[
                    # resident normalized keys: invariant block -> single buffer
                    pl.BlockSpec((Bp, Dp), lambda i: (0, 0),
                                 pipeline_mode=pl.Buffered(1)),
                    pl.BlockSpec((tq, 1), lambda i: (i, 0)),      # anchor labels
                    pl.BlockSpec((1, Bp), lambda i: (0, 0),       # key labels (resident)
                                 pipeline_mode=pl.Buffered(1)),
                ],
                out_specs=pl.BlockSpec((1, 8, 128), lambda i: (i, 0, 0)),
            ),
            compiler_params=pltpu.CompilerParams(
                dimension_semantics=("parallel",),
                vmem_limit_bytes=vmem_limit),
        )(feats_n, lab_col, lab_row)
    else:
        # ---- Kernel 2b: streaming key-tiled fallback ---------------------------
        num_k = Bp // tk
        kernel = functools.partial(_scl_loss_tiled_kernel,
                                   inv_t=inv_t, neg_scale=neg_scale, n_valid=int(B))
        est_tiled = (2 * (tk + tq) * Dp * isz + 2 * tk * 4 + 2 * tq * 4
                     + 5 * tq * tk * 4 + 3 * tq * 4 + 2 * 8 * 128 * 4 + (2 << 20))
        vmem_limit = int(min(max(est_tiled, 32 << 20), int(0.9 * vmem_cap)))
        per_tile = pl.pallas_call(
            kernel,
            out_shape=jax.ShapeDtypeStruct((num_q, 8, 128), jnp.float32),
            grid_spec=pltpu.PrefetchScalarGridSpec(
                num_scalar_prefetch=0,
                grid=(num_q, num_k),
                in_specs=[
                    pl.BlockSpec((tq, Dp), lambda i, k: (i, 0)),  # anchors (reused over k)
                    pl.BlockSpec((tk, Dp), lambda i, k: (k, 0)),  # streamed key tiles
                    pl.BlockSpec((tq, 1), lambda i, k: (i, 0)),   # anchor labels
                    pl.BlockSpec((1, tk), lambda i, k: (0, k)),   # key labels tile
                ],
                out_specs=pl.BlockSpec((1, 8, 128), lambda i, k: (i, 0, 0)),
                scratch_shapes=[pltpu.VMEM((tq, 1), jnp.float32),
                                pltpu.VMEM((tq, 1), jnp.float32),
                                pltpu.VMEM((tq, 1), jnp.float32)],
            ),
            compiler_params=pltpu.CompilerParams(
                dimension_semantics=("parallel", "arbitrary"),
                vmem_limit_bytes=vmem_limit),
        )(feats_n, feats_n, lab_col, lab_row)

    # final mean over the B real rows (padded rows were zeroed in-kernel)
    return jnp.sum(per_tile[:, 0, 0]) / B


# --------------------------------------------------------------------------
# Pure-JAX reference mirroring the PyTorch module exactly.
# --------------------------------------------------------------------------
def _reference_loss(features, labels, temperature=0.07, base_temperature=0.07):
    B = features.shape[0]
    f = features.astype(jnp.float32)
    norm = jnp.sqrt(jnp.sum(f * f, axis=1, keepdims=True))
    f_n = f / jnp.maximum(norm, 1e-12)
    logits = (f_n @ f_n.T) / temperature
    logits_mask = 1.0 - jnp.eye(B, dtype=jnp.float32)
    mask = (labels[:, None] == labels[None, :]).astype(jnp.float32) * logits_mask
    exp_logits = jnp.exp(logits) * logits_mask
    log_prob = logits - jnp.log(exp_logits.sum(1, keepdims=True) + 1e-08)
    mean_log_prob_pos = (mask * log_prob).sum(1) / (mask.sum(1) + 1e-08)
    loss = -(temperature / base_temperature) * mean_log_prob_pos
    return loss.mean()


if __name__ == "__main__":
    key = jax.random.PRNGKey(0)
    k1, k2, k3, k4, k5, k6 = jax.random.split(key, 6)

    # Case 1: aligned shapes, resident-key path, multi-step row-tile grid.
    B1, D1 = 16, 32
    f1 = jax.random.normal(k1, (B1, D1), dtype=jnp.float32)
    l1 = jax.random.randint(k2, (B1,), 0, 4, dtype=jnp.int32)
    out1 = jax.block_until_ready(supervised_contrastive_loss(f1, l1, tq=8))
    ref1 = _reference_loss(f1, l1)
    assert jnp.allclose(out1, ref1, atol=1e-4, rtol=1e-4), (out1, ref1)

    # Case 2: ragged shapes exercising row/column padding + in-kernel masking.
    B2, D2 = 13, 40
    f2 = jax.random.normal(k3, (B2, D2), dtype=jnp.float32)
    l2 = jax.random.randint(k4, (B2,), 0, 3, dtype=jnp.int32)
    out2 = jax.block_until_ready(supervised_contrastive_loss(f2, l2))
    ref2 = _reference_loss(f2, l2)
    assert jnp.allclose(out2, ref2, atol=1e-4, rtol=1e-4), (out2, ref2)

    # Case 3: forced key-tiled streaming fallback with a multi key-tile grid.
    B3, D3 = 200, 64
    f3 = jax.random.normal(k5, (B3, D3), dtype=jnp.float32)
    l3 = jax.random.randint(k6, (B3,), 0, 7, dtype=jnp.int32)
    out3 = jax.block_until_ready(
        supervised_contrastive_loss(f3, l3, tq=64, tk=128, force_key_tiling=True))
    ref3 = _reference_loss(f3, l3)
    assert jnp.allclose(out3, ref3, atol=1e-4, rtol=1e-4), (out3, ref3)

    # Case 4: bf16 inputs exercise the bf16 MXU path (loose tolerance: 1/T
    # amplifies the ~2^-8 bf16 similarity error).
    f4 = f1.astype(jnp.bfloat16)
    out4 = jax.block_until_ready(supervised_contrastive_loss(f4, l1, tq=16))
    assert bool(jnp.isfinite(out4)), out4
    assert jnp.allclose(out4, ref1, atol=0.25), (out4, ref1)

    print("KERNEL_OK")
</pallas_src>

<mosaic_0001>
module attributes {stable_mosaic.version = 11 : i64} {
  func.func @_normalize_kernel(%arg0: i32, %arg1: memref<16x128xf32, #tpu.memory_space<vmem>>, %arg2: memref<16x128xf32, #tpu.memory_space<vmem>>) attributes {dimension_semantics = [#tpu.dimension_semantics<parallel>], iteration_bounds = array<i64: 1>, scalar_prefetch = 0 : i64, scratch_operands = 0 : i64, tpu.core_type = #tpu.core_type<tc>, window_params = [{transform_indices = @transform_0, window_bounds = array<i64: 16, 128>}, {transform_indices = @transform_1, window_bounds = array<i64: 16, 128>}]} {
    %c0 = arith.constant 0 : index
    %c0_0 = arith.constant 0 : index
    %0 = vector.load %arg1[%c0, %c0_0] : memref<16x128xf32, #tpu.memory_space<vmem>>, vector<16x128xf32>
    %1 = arith.mulf %0, %0 : vector<16x128xf32>
    %cst = arith.constant dense<0.000000e+00> : vector<16xf32>
    %2 = vector.multi_reduction <add>, %1, %cst [1] : vector<16x128xf32> to vector<16xf32>
    %3 = vector.shape_cast %2 : vector<16xf32> to vector<16x1xf32>
    %cst_1 = arith.constant 1.000000e-24 : f32
    %4 = vector.broadcast %cst_1 : f32 to vector<16x1xf32>
    %5 = arith.maximumf %3, %4 : vector<16x1xf32>
    %6 = math.rsqrt %5 : vector<16x1xf32>
    %7 = vector.broadcast %6 : vector<16x1xf32> to vector<16x128xf32>
    %8 = arith.mulf %0, %7 : vector<16x128xf32>
    %c0_2 = arith.constant 0 : index
    %c0_3 = arith.constant 0 : index
    %9 = vector.load %arg2[%c0_2, %c0_3] : memref<16x128xf32, #tpu.memory_space<vmem>>, vector<16x128xf32>
    tpu.vector_store %arg2[%c0_2, %c0_3], %8 {strides = array<i32>} : memref<16x128xf32, #tpu.memory_space<vmem>>, vector<16x128xf32>,
    return
  }
  func.func @transform_0(%arg0: i32) -> (i32, i32) {
    %c0_i32 = arith.constant 0 : i32
    %c0_i32_0 = arith.constant 0 : i32
    return %arg0, %c0_i32 : i32, i32
  }
  func.func @transform_1(%arg0: i32) -> (i32, i32) {
    %c0_i32 = arith.constant 0 : i32
    %c0_i32_0 = arith.constant 0 : i32
    return %arg0, %c0_i32 : i32, i32
  }
}

</mosaic_0001>

<bundles_post_ra>
// kernel: tpu_custom_call.1
= control target key start
LH: loop header
LB: loop body
LE: loop exit
PB: predicated region body
PF: predicated region fallthrough
CT: control target
= control target key end

     0   :  { %6 = vsyncpa [#allocation3], 0  ;;  %s156_s0 = inlined_call_operand.hbm [shape: f32[16,128], index: 0, kind: input, shape index: {}]   ;;  %s157_s1 = inlined_call_operand.hbm [shape: f32[16,128], index: 1, kind: output, shape index: {}]  }
   0x1   :  { %7 = vsyncpa [#allocation4], 0  ;;  %s112_s6 = smov [#allocation2]   ;;  %s64_s10 = scalar_lea.hbm %s156_s0, 256 }
   0x2   :  { %s13_s7 = sshll.u32 %s112_s6, 4  ;;  %p65_p0 = scmp.ne.s32.totalorder %s156_s0, %s64_s10  ;;  %s14_s7 = int_to_ptr.vmem [resolvable:$true] %s13_s7 }
   0x3   :  { %p68_p1 = scmp.lt.u32.totalorder %s64_s10, %s156_s0 }
   0x5   :  { %p70_p2 = pnand %p68_p1, %p65_p0 }
   0x7   :  { %73 = shalt.err (!%p70_p2)
}
   0x8   :  { %s74_s15 = scalar_lea.vmem %s14_s7, 256  ;;  %p79_p4 = scmp.lt.s32.totalorder %s14_s7, %s14_s7 }
   0x9   :  { %p75_p3 = scmp.ne.s32.totalorder %s14_s7, %s74_s15  ;;  %p80_p5 = scmp.lt.s32.totalorder %s74_s15, %s74_s15 }
   0xb   :  { %p81_p6 = por %p80_p5, %p79_p4 }
   0xd   :  { %p82_p7 = pnand %p81_p6, %p75_p3 }
   0xf   :  { %85 = shalt.err (!%p82_p7)
}
  0x10   :  { %s113_s16 = smov 128   ;;  %s114_s17 = smov 8  }
  0x11   :  { %19 = dma.hbm_to_vmem [thread:$0]  %s156_s0, 256, %s14_s7, [#allocation3], %s113_s16, %s113_s16, %s114_s17  }
  0x12   :  { %108 = dma.done.wait [#allocation3], 256  }
  0x13   :  { %109 = vsyncadd [#allocation3], 4294967040  ;;  %v23_v0 = vld [vmem:[#allocation2] sm:$0xff]  ;;  %v24_v1 = vld [vmem:[#allocation2 + $0x8] sm:$0xff]  ;;  %s115_s20 = smov [#allocation5]  }
  0x14   :  { %v25_v2 = vmul.f32 %v23_v0, %v23_v0  ;;  %v26_v3 = vmul.f32 %v24_v1, %v24_v1  ;;  %s44_s21 = sshll.u32 %s115_s20, 4  ;;  %s45_s21 = int_to_ptr.vmem [resolvable:$true] %s44_s21 }
  0x15   :  { %s86_s0 = scalar_lea.vmem %s45_s21, 256  ;;  %p91_p9 = scmp.lt.s32.totalorder %s45_s21, %s45_s21 }
  0x16   :  { %27 = vadd.xlane.f32.xlu0 %v25_v2  ;;  %p87_p8 = scmp.ne.s32.totalorder %s45_s21, %s86_s0  ;;  %p92_p10 = scmp.lt.s32.totalorder %s86_s0, %s86_s0 }
  0x18   :  { %p93_p11 = por %p92_p10, %p91_p9 }
  0x1a   :  { %29 = vadd.xlane.f32.xlu0 %v26_v3  ;;  %p94_p12 = pnand %p93_p11, %p87_p8 }
  0xa3   :  { %v28_v4 = vpop.xlane.xlu0 %27 }
  0xa4   :  { %v31_v5 = vmax.f32 %v28_v4, 1e-24 }
  0xa6   :  { %60 = vrsqrt.f32 %v31_v5 }
  0xa7   :  { %v30_v6 = vpop.xlane.xlu0 %29 }
  0xa8   :  { %v32_v7 = vmax.f32 %v30_v6, 1e-24 }
  0xaa   :  { %62 = vrsqrt.f32 %v32_v7 }
  0xb0   :  { %v61_v8 = vpop.eup %60 }
  0xb1   :  { %v35_v9 = vmul.f32 %v61_v8, %v23_v0 }
  0xb3   :  { %37 = vst [vmem:[#allocation5] sm:$0xff] %v35_v9 }
  0xb4   :  { %v63_v10 = vpop.eup %62 }
  0xb5   :  { %v36_v11 = vmul.f32 %v63_v10, %v24_v1 }
  0xb7   :  { %38 = vst [vmem:[#allocation5 + $0x8] sm:$0xff] %v36_v11 }
  0xb8   :  { %97 = shalt.err (!%p94_p12)
}
  0xb9   :  { %s98_s24 = scalar_lea.hbm %s157_s1, 256 }
  0xba   :  { %p99_p13 = scmp.ne.s32.totalorder %s157_s1, %s98_s24  ;;  %p102_p0 = scmp.lt.u32.totalorder %s98_s24, %s157_s1 }
  0xbc   :  { %p104_p1 = pnand %p102_p0, %p99_p13 }
  0xbe   :  { %107 = shalt.err (!%p104_p1)
}
  0xbf   :  { %50 = dma.vmem_to_hbm [thread:$0]  %s45_s21, 256, %s157_s1, [#allocation4], %s113_s16, %s113_s16, %s114_s17  }
  0xc0   :  { %110 = dma.done.wait [#allocation4], 256  }
  0xc1   :  { %111 = vsyncadd [#allocation4], 4294967040 }
  0xc2   :  { %54 = vsyncpa [#allocation3], 1 }
  0xc3   :  { %55 = vsyncpa [#allocation4], 1 }

</bundles_post_ra>
